<compile_context>
chip_gen: v5e
topology: v5e:2x2
jax: 0.10.0
libtpu: 0.0.40
codegen_flags: <defaults>
</compile_context>

<pallas_src>
import jax
import jax.numpy as jnp
from jax.experimental import pallas as pl
from jax.experimental.pallas import tpu as pltpu

# ---------------------------------------------------------------------------
# Model hyper-parameters (small, consistent with the module's constructor).
# ---------------------------------------------------------------------------
BATCH = 2
SEQ = 16
HIDDEN = 32
N_LABELS = 8
VOCAB = 320
LABEL_IGNORE_IDX = 0
HEAD_INIT_RANGE = 0.04

TOKENS = BATCH * SEQ          # 32 flattened tokens — whole problem in one shot
LABEL_PAD = 128               # lane-dense logits slab (last dim padded to 128)
STAT_ROWS = 8                 # spare sublane-aligned rows holding loss / count


# ---------------------------------------------------------------------------
# Pallas kernel: fused (W1-folded) embedding gather + head + masked CE loss.
# No grid; every block fully resident in VMEM.
# ---------------------------------------------------------------------------
def _fused_kernel(meta_ref, ew1_ref, wc_ref, fbias_ref, out_ref):
    meta = meta_ref[...]                       # (T, 3) int32: [ids | labels | valid]
    ids = meta[:, 0:1]
    labels = meta[:, 1:2]
    valid = meta[:, 2:3]

    # --- fused stand-in backbone + linear_1 (folded offline into the table).
    # Embedding gather as a one-hot MXU matmul: exactly one 1.0 per row, so the
    # f32 accumulation reproduces the bf16 table row exactly.
    vocab_ids = jax.lax.broadcasted_iota(jnp.int32, (TOKENS, VOCAB), 1)
    onehot = (vocab_ids == ids).astype(jnp.bfloat16)                    # (T, V) bf16
    h = jnp.dot(onehot, ew1_ref[...], preferred_element_type=jnp.float32)
    h = h + fbias_ref[0:TOKENS, 0:HIDDEN]          # + (pos @ W1 + b1), f32
    h = jnp.maximum(h, 0.0)                        # ReLU; dropout = eval identity

    # --- classification head, lane-padded to 128 so stores are full-width.
    logits = jnp.dot(h.astype(jnp.bfloat16), wc_ref[...],
                     preferred_element_type=jnp.float32)
    logits = logits + fbias_ref[TOKENS:TOKENS + 1, :]                   # + bc (padded)
    out_ref[0:TOKENS, :] = logits

    # --- masked cross-entropy (ignore_index + valid_mask), all in f32.
    lane_ids = jax.lax.broadcasted_iota(jnp.int32, (TOKENS, LABEL_PAD), 1)
    masked = jnp.where(lane_ids < N_LABELS, logits, -1e30)              # hide pad lanes
    m = jnp.max(masked, axis=-1, keepdims=True)                         # (T, 1)
    lse = m + jnp.log(jnp.sum(jnp.exp(masked - m), axis=-1, keepdims=True))
    # NOTE: assumes labels < N_LABELS (true by construction here); otherwise a
    # pad-lane logit would be silently picked.
    picked = jnp.sum(jnp.where(lane_ids == labels, logits, 0.0),
                     axis=-1, keepdims=True)                            # (T, 1)
    per_tok = lse - picked

    active = jnp.logical_and(valid == 1, labels != LABEL_IGNORE_IDX)
    per_tok = jnp.where(active, per_tok, 0.0)

    total = jnp.sum(per_tok, axis=0, keepdims=True)                     # (1, 1)
    count = jnp.sum(active.astype(jnp.float32), axis=0, keepdims=True)  # (1, 1)
    loss = total / jnp.maximum(count, 1.0)

    # Stats row folded into the output slab: loss at [TOKENS, 0], count at [TOKENS, 1].
    stat_lane = jax.lax.broadcasted_iota(jnp.int32, (STAT_ROWS, LABEL_PAD), 1)
    out_ref[TOKENS:TOKENS + STAT_ROWS, :] = jnp.where(
        stat_lane == 0, loss, jnp.where(stat_lane == 1, count, 0.0))


# ---------------------------------------------------------------------------
# Parameter init + one-time kernel-side packing (outside the hot path).
# ---------------------------------------------------------------------------
def init_params(key):
    k_emb, k_pos, k_w1, k_b1, k_wc = jax.random.split(key, 5)
    return {
        # TODO(synk): stand-in for the pretrained ReformerModel backbone
        # (LSH-attention stack not translated) — deterministic embedding tables.
        "tok_emb": jax.random.normal(k_emb, (VOCAB, HIDDEN), jnp.float32) * 0.02,
        "pos_emb": jax.random.normal(k_pos, (SEQ, HIDDEN), jnp.float32) * 0.02,
        # nn.Linear(hidden, hidden): stored as (in, out) = weight.T
        "w1": jax.random.normal(k_w1, (HIDDEN, HIDDEN), jnp.float32)
              * (1.0 / jnp.sqrt(HIDDEN)),
        "b1": jax.random.normal(k_b1, (1, HIDDEN), jnp.float32) * 0.01,
        # classification_head.weight.normal_(0, 0.04), stored as (in, out)
        "wc": jax.random.normal(k_wc, (HIDDEN, N_LABELS), jnp.float32)
              * HEAD_INIT_RANGE,
        "bc": jnp.zeros((1, N_LABELS), jnp.float32),
    }


def pack_kernel_params(params):
    """One-time repack: fold linear_1 into the tables, bf16 MXU weights,
    lane-padded head, PB + bc fused into a single f32 block."""
    pos_full = jnp.tile(params["pos_emb"], (BATCH, 1))                  # (T, H)

    # Fold linear_1 (legal by linearity, ReLU comes after the affine map):
    #   x@W1 + b1 = tok_emb[ids]@W1 + (pos@W1 + b1)
    ew1 = jnp.dot(params["tok_emb"], params["w1"],
                  precision=jax.lax.Precision.HIGHEST).astype(jnp.bfloat16)  # (V, H)
    pb = jnp.dot(pos_full, params["w1"],
                 precision=jax.lax.Precision.HIGHEST) + params["b1"]         # (T, H) f32

    wc_pad = jnp.zeros((HIDDEN, LABEL_PAD), jnp.bfloat16)
    wc_pad = wc_pad.at[:, :N_LABELS].set(params["wc"].astype(jnp.bfloat16))
    bc_pad = jnp.zeros((LABEL_PAD,), jnp.float32)
    bc_pad = bc_pad.at[:N_LABELS].set(params["bc"][0])

    # Single f32 block carrying PB (rows 0..T-1, lanes 0..H-1) and bc (row T).
    fbias = jnp.zeros((TOKENS + STAT_ROWS, LABEL_PAD), jnp.float32)
    fbias = fbias.at[:TOKENS, :HIDDEN].set(pb)
    fbias = fbias.at[TOKENS, :].set(bc_pad)

    return {"ew1": ew1, "wc_pad": wc_pad, "fbias": fbias}


# ---------------------------------------------------------------------------
# Forward wrapper.
# ---------------------------------------------------------------------------
@jax.jit
def reformer_forward(kp, input_ids, labels, valid_mask):
    """input_ids/labels/valid_mask: (B, S) int32. Returns (loss, logits(B,S,L))."""
    # Pack the three tiny int inputs into one (T, 3) block -> one DMA.
    meta = jnp.stack(
        [input_ids.reshape(-1), labels.reshape(-1), valid_mask.reshape(-1)],
        axis=1).astype(jnp.int32)                                        # (T, 3)

    vmem = pl.BlockSpec(memory_space=pltpu.MemorySpace.VMEM)
    out = pl.pallas_call(
        _fused_kernel,
        out_shape=jax.ShapeDtypeStruct((TOKENS + STAT_ROWS, LABEL_PAD), jnp.float32),
        in_specs=[vmem, vmem, vmem, vmem],
        out_specs=vmem,
    )(meta, kp["ew1"], kp["wc_pad"], kp["fbias"])

    logits = out[:TOKENS, :N_LABELS].reshape(BATCH, SEQ, N_LABELS)
    loss = out[TOKENS, 0]
    return loss, logits


# ---------------------------------------------------------------------------
# References for verification.
# ---------------------------------------------------------------------------
def _masked_ce(logits, labels, valid_mask):
    lab = labels.reshape(-1)
    val = valid_mask.reshape(-1)
    logp = jax.nn.log_softmax(logits, axis=-1)
    per_tok = -jnp.take_along_axis(logp, lab[:, None], axis=-1)[:, 0]
    active = (val == 1) & (lab != LABEL_IGNORE_IDX)
    denom = jnp.maximum(jnp.sum(active.astype(jnp.float32)), 1.0)
    return jnp.sum(jnp.where(active, per_tok, 0.0)) / denom


def reference_kernel_numerics(kp, input_ids, labels, valid_mask):
    """Mirrors the kernel's folded / bf16-operand math exactly."""
    ids = input_ids.reshape(-1)
    pb = kp["fbias"][:TOKENS, :HIDDEN]
    bc = kp["fbias"][TOKENS]
    h = jnp.maximum(kp["ew1"].astype(jnp.float32)[ids] + pb, 0.0)
    logits_pad = jnp.dot(h.astype(jnp.bfloat16), kp["wc_pad"],
                         preferred_element_type=jnp.float32) + bc
    logits = logits_pad[:, :N_LABELS]
    loss = _masked_ce(logits, labels, valid_mask)
    return loss, logits.reshape(BATCH, SEQ, N_LABELS)


def reference_f32(params, input_ids, labels, valid_mask):
    """Pure f32 semantic ground truth (un-folded, HIGHEST precision)."""
    ids = input_ids.reshape(-1)
    pos_full = jnp.tile(params["pos_emb"], (BATCH, 1))
    x = params["tok_emb"][ids] + pos_full
    h = jnp.maximum(
        jnp.dot(x, params["w1"], precision=jax.lax.Precision.HIGHEST)
        + params["b1"], 0.0)
    logits = jnp.dot(h, params["wc"],
                     precision=jax.lax.Precision.HIGHEST) + params["bc"]
    loss = _masked_ce(logits, labels, valid_mask)
    return loss, logits.reshape(BATCH, SEQ, N_LABELS)


# ---------------------------------------------------------------------------
if __name__ == "__main__":
    key = jax.random.PRNGKey(0)
    k_par, k_ids, k_lab, k_val = jax.random.split(key, 4)

    params = init_params(k_par)
    kp = pack_kernel_params(params)

    input_ids = jax.random.randint(k_ids, (BATCH, SEQ), 0, VOCAB, jnp.int32)
    labels = jax.random.randint(k_lab, (BATCH, SEQ), 0, N_LABELS, jnp.int32)
    labels_mask = jnp.ones((BATCH, SEQ), jnp.int32)   # present -> valid_mask branch taken
    valid_mask = jax.random.randint(k_val, (BATCH, SEQ), 0, 2, jnp.int32)

    loss, logits = reformer_forward(kp, input_ids, labels, valid_mask)
    loss = jax.block_until_ready(loss)
    logits = jax.block_until_ready(logits)

    # Tight check against a reference with matching folded / bf16-operand numerics.
    ref_loss, ref_logits = reference_kernel_numerics(kp, input_ids, labels, valid_mask)
    assert jnp.allclose(logits, ref_logits, atol=1e-5, rtol=1e-5), "logits mismatch"
    assert jnp.allclose(loss, ref_loss, atol=1e-5, rtol=1e-5), "loss mismatch"

    # Loose check against the pure-f32 semantic reference (bf16 MXU operands and
    # the W1 fold cost well under these tolerances at this scale).
    f32_loss, f32_logits = reference_f32(params, input_ids, labels, valid_mask)
    assert jnp.allclose(logits, f32_logits, atol=5e-3), "logits far from f32 reference"
    assert jnp.allclose(loss, f32_loss, atol=2e-2), "loss far from f32 reference"

    print("KERNEL_OK")
</pallas_src>

<mosaic_0001>
module attributes {stable_mosaic.version = 11 : i64} {
  func.func @_fused_kernel(%arg0: memref<32x3xi32, #tpu.memory_space<vmem>>, %arg1: memref<320x32xbf16, #tpu.memory_space<vmem>>, %arg2: memref<32x128xbf16, #tpu.memory_space<vmem>>, %arg3: memref<40x128xf32, #tpu.memory_space<vmem>>, %arg4: memref<40x128xf32, #tpu.memory_space<vmem>>) attributes {dimension_semantics = [], scalar_prefetch = 0 : i64, scratch_operands = 0 : i64, tpu.core_type = #tpu.core_type<tc>} {
    %c0 = arith.constant 0 : index
    %c0_0 = arith.constant 0 : index
    %0 = vector.load %arg0[%c0, %c0_0] : memref<32x3xi32, #tpu.memory_space<vmem>>, vector<32x3xi32>
    %1 = vector.extract_strided_slice %0 {offsets = [0, 0], sizes = [32, 1], strides = [1, 1]} : vector<32x3xi32> to vector<32x1xi32>
    %2 = vector.extract_strided_slice %0 {offsets = [0, 1], sizes = [32, 1], strides = [1, 1]} : vector<32x3xi32> to vector<32x1xi32>
    %3 = vector.extract_strided_slice %0 {offsets = [0, 2], sizes = [32, 1], strides = [1, 1]} : vector<32x3xi32> to vector<32x1xi32>
    %4 = tpu.iota {dimensions = array<i32: 1>} : vector<32x320xi32>
    %5 = vector.broadcast %1 : vector<32x1xi32> to vector<32x320xi32>
    %6 = arith.cmpi eq, %4, %5 : vector<32x320xi32>
    %7 = arith.extui %6 : vector<32x320xi1> to vector<32x320xi32>
    %8 = arith.sitofp %7 : vector<32x320xi32> to vector<32x320xf32>
    %9 = arith.truncf %8 : vector<32x320xf32> to vector<32x320xbf16>
    %c0_1 = arith.constant 0 : index
    %c0_2 = arith.constant 0 : index
    %10 = vector.load %arg1[%c0_1, %c0_2] : memref<320x32xbf16, #tpu.memory_space<vmem>>, vector<320x32xbf16>
    %cst = arith.constant dense<0.000000e+00> : vector<32x32xf32>
    %11 = tpu.matmul %9, %10, %cst {dimension_numbers = #tpu.dot_dimension_numbers<[1], [0], [0], [1], [0, 0, 1, 1], [], []>} : vector<32x320xbf16>, vector<320x32xbf16>, vector<32x32xf32> -> vector<32x32xf32>
    %c0_3 = arith.constant 0 : index
    %c0_4 = arith.constant 0 : index
    %12 = vector.load %arg3[%c0_3, %c0_4] : memref<40x128xf32, #tpu.memory_space<vmem>>, vector<32x32xf32>
    %13 = arith.addf %11, %12 : vector<32x32xf32>
    %cst_5 = arith.constant 0.000000e+00 : f32
    %14 = vector.broadcast %cst_5 : f32 to vector<32x32xf32>
    %15 = arith.maximumf %13, %14 : vector<32x32xf32>
    %16 = arith.truncf %15 : vector<32x32xf32> to vector<32x32xbf16>
    %c0_6 = arith.constant 0 : index
    %c0_7 = arith.constant 0 : index
    %17 = vector.load %arg2[%c0_6, %c0_7] : memref<32x128xbf16, #tpu.memory_space<vmem>>, vector<32x128xbf16>
    %cst_8 = arith.constant dense<0.000000e+00> : vector<32x128xf32>
    %18 = tpu.matmul %16, %17, %cst_8 {dimension_numbers = #tpu.dot_dimension_numbers<[1], [0], [0], [1], [0, 0, 1, 1], [], []>} : vector<32x32xbf16>, vector<32x128xbf16>, vector<32x128xf32> -> vector<32x128xf32>
    %c32 = arith.constant 32 : index
    %c0_9 = arith.constant 0 : index
    %19 = vector.load %arg3[%c32, %c0_9] : memref<40x128xf32, #tpu.memory_space<vmem>>, vector<1x128xf32>
    %20 = vector.broadcast %19 : vector<1x128xf32> to vector<32x128xf32>
    %21 = arith.addf %18, %20 : vector<32x128xf32>
    %c0_10 = arith.constant 0 : index
    %c0_11 = arith.constant 0 : index
    %22 = vector.load %arg4[%c0_10, %c0_11] : memref<40x128xf32, #tpu.memory_space<vmem>>, vector<32x128xf32>
    tpu.vector_store %arg4[%c0_10, %c0_11], %21 {strides = array<i32>} : memref<40x128xf32, #tpu.memory_space<vmem>>, vector<32x128xf32>,
    %23 = tpu.iota {dimensions = array<i32: 1>} : vector<32x128xi32>
    %c8_i32 = arith.constant 8 : i32
    %24 = vector.broadcast %c8_i32 : i32 to vector<32x128xi32>
    %25 = arith.cmpi slt, %23, %24 : vector<32x128xi32>
    %cst_12 = arith.constant -1.000000e+30 : f32
    %26 = vector.broadcast %cst_12 : f32 to vector<32x128xf32>
    %27 = arith.select %25, %21, %26 : vector<32x128xi1>, vector<32x128xf32>
    %cst_13 = arith.constant dense<0xFF800000> : vector<32xf32>
    %28 = vector.multi_reduction <maximumf>, %27, %cst_13 [1] : vector<32x128xf32> to vector<32xf32>
    %29 = vector.shape_cast %28 : vector<32xf32> to vector<32x1xf32>
    %30 = vector.broadcast %29 : vector<32x1xf32> to vector<32x128xf32>
    %31 = arith.subf %27, %30 : vector<32x128xf32>
    %32 = math.exp %31 : vector<32x128xf32>
    %cst_14 = arith.constant dense<0.000000e+00> : vector<32xf32>
    %33 = vector.multi_reduction <add>, %32, %cst_14 [1] : vector<32x128xf32> to vector<32xf32>
    %34 = vector.shape_cast %33 : vector<32xf32> to vector<32x1xf32>
    %35 = math.log %34 : vector<32x1xf32>
    %36 = arith.addf %29, %35 : vector<32x1xf32>
    %37 = vector.broadcast %2 : vector<32x1xi32> to vector<32x128xi32>
    %38 = arith.cmpi eq, %23, %37 : vector<32x128xi32>
    %cst_15 = arith.constant 0.000000e+00 : f32
    %39 = vector.broadcast %cst_15 : f32 to vector<32x128xf32>
    %40 = arith.select %38, %21, %39 : vector<32x128xi1>, vector<32x128xf32>
    %cst_16 = arith.constant dense<0.000000e+00> : vector<32xf32>
    %41 = vector.multi_reduction <add>, %40, %cst_16 [1] : vector<32x128xf32> to vector<32xf32>
    %42 = vector.shape_cast %41 : vector<32xf32> to vector<32x1xf32>
    %43 = arith.subf %36, %42 : vector<32x1xf32>
    %c1_i32 = arith.constant 1 : i32
    %44 = vector.broadcast %c1_i32 : i32 to vector<32x1xi32>
    %45 = arith.cmpi eq, %3, %44 : vector<32x1xi32>
    %c0_i32 = arith.constant 0 : i32
    %46 = vector.broadcast %c0_i32 : i32 to vector<32x1xi32>
    %47 = arith.cmpi ne, %2, %46 : vector<32x1xi32>
    %48 = arith.andi %45, %47 : vector<32x1xi1>
    %cst_17 = arith.constant 0.000000e+00 : f32
    %49 = vector.broadcast %cst_17 : f32 to vector<32x1xf32>
    %50 = arith.select %48, %43, %49 : vector<32x1xi1>, vector<32x1xf32>
    %cst_18 = arith.constant dense<0.000000e+00> : vector<1xf32>
    %51 = vector.multi_reduction <add>, %50, %cst_18 [0] : vector<32x1xf32> to vector<1xf32>
    %52 = vector.shape_cast %51 : vector<1xf32> to vector<1x1xf32>
    %53 = arith.extui %48 : vector<32x1xi1> to vector<32x1xi32>
    %54 = arith.sitofp %53 : vector<32x1xi32> to vector<32x1xf32>
    %cst_19 = arith.constant dense<0.000000e+00> : vector<1xf32>
    %55 = vector.multi_reduction <add>, %54, %cst_19 [0] : vector<32x1xf32> to vector<1xf32>
    %56 = vector.shape_cast %55 : vector<1xf32> to vector<1x1xf32>
    %cst_20 = arith.constant 1.000000e+00 : f32
    %57 = vector.broadcast %cst_20 : f32 to vector<1x1xf32>
    %58 = arith.maximumf %56, %57 : vector<1x1xf32>
    %59 = arith.divf %52, %58 : vector<1x1xf32>
    %60 = tpu.iota {dimensions = array<i32: 1>} : vector<8x128xi32>
    %c0_i32_21 = arith.constant 0 : i32
    %61 = vector.broadcast %c0_i32_21 : i32 to vector<8x128xi32>
    %62 = arith.cmpi eq, %60, %61 : vector<8x128xi32>
    %c1_i32_22 = arith.constant 1 : i32
    %63 = vector.broadcast %c1_i32_22 : i32 to vector<8x128xi32>
    %64 = arith.cmpi eq, %60, %63 : vector<8x128xi32>
    %cst_23 = arith.constant 0.000000e+00 : f32
    %65 = vector.shape_cast %56 : vector<1x1xf32> to vector<1x1xf32>
    %66 = vector.broadcast %65 : vector<1x1xf32> to vector<8x128xf32>
    %67 = vector.broadcast %cst_23 : f32 to vector<8x128xf32>
    %68 = arith.select %64, %66, %67 : vector<8x128xi1>, vector<8x128xf32>
    %69 = vector.shape_cast %59 : vector<1x1xf32> to vector<1x1xf32>
    %70 = vector.broadcast %69 : vector<1x1xf32> to vector<8x128xf32>
    %71 = arith.select %62, %70, %68 : vector<8x128xi1>, vector<8x128xf32>
    %c32_24 = arith.constant 32 : index
    %c0_25 = arith.constant 0 : index
    %72 = vector.load %arg4[%c32_24, %c0_25] : memref<40x128xf32, #tpu.memory_space<vmem>>, vector<8x128xf32>
    tpu.vector_store %arg4[%c32_24, %c0_25], %71 {strides = array<i32>} : memref<40x128xf32, #tpu.memory_space<vmem>>, vector<8x128xf32>,
    return
  }
}

</mosaic_0001>

<bundles_post_ra>
// kernel: reformer_forward.1
= control target key start
LH: loop header
LB: loop body
LE: loop exit
PB: predicated region body
PF: predicated region fallthrough
CT: control target
= control target key end

     0   :  { %v709_v0 = vmov 0   ;;  %v22_v25 = vlaneseq  ;;  %v710_v32 = vmov 0.0   ;;  %vm244_vm7 = vcmask 523264   ;;  %s713_s28 = smov 1   ;;  %s979_s0 = inlined_call_operand.vmem [shape: s32[32,3], index: 0, kind: input, shape index: {}]   ;;  %s980_s1 = inlined_call_operand.vmem [shape: bf16[320,32], index: 1, kind: input, shape index: {}]   ;;  %s981_s3 = inlined_call_operand.vmem [shape: f32[40,128], index: 3, kind: input, shape index: {}]   ;;  %s982_s2 = inlined_call_operand.vmem [shape: bf16[32,128], index: 2, kind: input, shape index: {}]   ;;  %s983_s4 = inlined_call_operand.vmem [shape: f32[40,128], index: 4, kind: output, shape index: {}]  }
   0x1   :  { %685 = vset.pattern.permute.xlu0 %v709_v0  ;;  %v744_v1 = vld [vmem:[%s979_s0] sm:$0xff]  ;;  %686 = vset.pattern.permute.xlu1 %v709_v0  ;;  %v750_v2 = vld [vmem:[%s979_s0 + $0x10] sm:$0xff]  ;;  %v664_v3 = vld [vmem:[%s980_s1 + $0x38] sm:$0xff]  ;;  %v711_v35 = vmov 1.0|1.0   ;;  %v712_v49 = vmov 1  }
   0x2   :  { %27 = vperm.xlu0 %685, %v744_v1   ;;  %33 = vperm.xlu1 %686, %v750_v2   ;;  %v672_v4 = vld [vmem:[%s980_s1 + $0x78] sm:$0xff]  ;;  %v663_v5 = vld [vmem:[%s980_s1 + $0x30] sm:$0xff]  ;;  %v772_v8 = vld [vmem:[%s979_s0 + $0x8] sm:$0xff]  ;;  %v826_v26 = vand.u32 127, %v22_v25 }
   0x3   :  { %251 = vmatpush.bf16.msra.mxu0 %v664_v3  ;;  %270 = vmatpush.bf16.msra.mxu1 %v672_v4  ;;  %v671_v6 = vld [vmem:[%s980_s1 + $0x70] sm:$0xff]  ;;  %v676_v7 = vld [vmem:[%s980_s1 + $0x98] sm:$0xff]  ;;  %v662_v10 = vld [vmem:[%s980_s1 + $0x28] sm:$0xff] }
   0x4   :  { %v777_v9 = vld [vmem:[%s979_s0 + $0x18] sm:$0xff]  ;;  %293 = vmatpush.bf16.msra.mxu2 %v676_v7  ;;  %v670_v11 = vld [vmem:[%s980_s1 + $0x68] sm:$0xff]  ;;  %v661_v12 = vld [vmem:[%s980_s1 + $0x20] sm:$0xff]  ;;  %v25_v28 = vadd.s32 256, %v826_v26  ;;  %v24_v29 = vadd.s32 128, %v826_v26  ;;  %687 = vset.pattern.permute.xlu2 %v712_v49 }
   0x5   :  { %v669_v13 = vld [vmem:[%s980_s1 + $0x60] sm:$0xff]  ;;  %v660_v14 = vld [vmem:[%s980_s1 + $0x18] sm:$0xff]  ;;  %v659_v16 = vld [vmem:[%s980_s1 + $0x10] sm:$0xff]  ;;  %408 = vperm.xlu2 %687, %v744_v1  }
   0x6   :  { %v668_v15 = vld [vmem:[%s980_s1 + $0x58] sm:$0xff]  ;;  %v667_v17 = vld [vmem:[%s980_s1 + $0x50] sm:$0xff]  ;;  %v658_v19 = vld [vmem:[%s980_s1 + $0x8] sm:$0xff] }
   0x7   :  { %252 = vmatpush.bf16.msra.mxu0 %v663_v5  ;;  %271 = vmatpush.bf16.msra.mxu1 %v671_v6  ;;  %v675_v18 = vld [vmem:[%s980_s1 + $0x90] sm:$0xff]  ;;  %v666_v20 = vld [vmem:[%s980_s1 + $0x48] sm:$0xff]  ;;  %v657_v22 = vld [vmem:[%s980_s1] sm:$0xff] }
   0x8   :  { %294 = vmatpush.bf16.msra.mxu2 %v675_v18  ;;  %v674_v21 = vld [vmem:[%s980_s1 + $0x88] sm:$0xff]  ;;  %v665_v23 = vld [vmem:[%s980_s1 + $0x40] sm:$0xff]  ;;  %v122_v63 = vld [vmem:[%s981_s3 + $0x10] sm:$0xff] }
   0x9   :  { %v673_v24 = vld [vmem:[%s980_s1 + $0x80] sm:$0xff]  ;;  %v678_v41 = vld [vmem:[%s982_s2 + $0x8] sm:$0xff]  ;;  %v123_v3 = vld [vmem:[%s981_s3 + $0x18] sm:$0xff] }
   0xa   :  { %30 = vperm.xlu0 %685, %v772_v8   ;;  %36 = vperm.xlu1 %686, %v777_v9   ;;  %v677_v42 = vld [vmem:[%s982_s2] sm:$0xff]  ;;  %v121_v46 = vld [vmem:[%s981_s3 + $0x8] sm:$0xff] }
   0xb   :  { %253 = vmatpush.bf16.msra.mxu0 %v662_v10  ;;  %272 = vmatpush.bf16.msra.mxu1 %v670_v11  ;;  %v120_v45 = vld [vmem:[%s981_s3] sm:$0xff] }
   0xc   :  { %295 = vmatpush.bf16.msra.mxu2 %v674_v21  ;;  %345 = vmatpush.bf16.msra.mxu3 %v678_v41 }
   0xd   :  { %411 = vperm.xlu2 %687, %v772_v8  }
   0xf   :  { %254 = vmatpush.bf16.msra.mxu0 %v661_v12  ;;  %273 = vmatpush.bf16.msra.mxu1 %v669_v13 }
  0x10   :  { %296 = vmatpush.bf16.msra.mxu2 %v673_v24  ;;  %346 = vmatpush.bf16.msra.mxu3 %v677_v42 }
  0x13   :  { %255 = vmatpush.bf16.msra.mxu0 %v660_v14  ;;  %274 = vmatpush.bf16.msra.mxu1 %v668_v15 }
  0x15   :  { %414 = vperm.xlu2 %687, %v750_v2  }
  0x17   :  { %256 = vmatpush.bf16.msra.mxu0 %v659_v16  ;;  %275 = vmatpush.bf16.msra.mxu1 %v667_v17 }
  0x1b   :  { %257 = vmatpush.bf16.msra.mxu0 %v658_v19  ;;  %276 = vmatpush.bf16.msra.mxu1 %v666_v20  ;;  %v690_v19 = vld [vmem:[%s981_s3 + $0x20] ss:$0 sm:$0xff] }
  0x1d   :  { %417 = vperm.xlu2 %687, %v777_v9  }
  0x1f   :  { %258 = vmatpush.bf16.msra.mxu0 %v657_v22  ;;  %277 = vmatpush.bf16.msra.mxu1 %v665_v23 }
  0x74   :  { %v28_v27 = vpop.permute.xlu0 %27  ;;  %v34_v30 = vpop.permute.xlu1 %33 }
  0x75   :  { %vm40_vm0 = vcmp.eq.s32.totalorder %v25_v28, %v28_v27  ;;  %vm38_vm2 = vcmp.eq.s32.totalorder %v826_v26, %v28_v27  ;;  %vm39_vm6 = vcmp.eq.s32.totalorder %v24_v29, %v28_v27  ;;  %vm46_vm9 = vcmp.eq.s32.totalorder %v25_v28, %v34_v30 }
  0x76   :  { %v543_v33 = vsel %vm40_vm0, 1.0, %v710_v32  ;;  %vm44_vm11 = vcmp.eq.s32.totalorder %v826_v26, %v34_v30  ;;  %v549_v38 = vsel %vm46_vm9, 1.0, %v710_v32  ;;  %vm45_vm13 = vcmp.eq.s32.totalorder %v24_v29, %v34_v30 }
  0x7c   :  { %v31_v31 = vpop.permute.xlu0 %30  ;;  %v37_v37 = vpop.permute.xlu1 %36 }
  0x7d   :  { %vm43_vm1 = vcmp.eq.s32.totalorder %v25_v28, %v31_v31  ;;  %vm41_vm3 = vcmp.eq.s32.totalorder %v826_v26, %v31_v31  ;;  %vm42_vm4 = vcmp.eq.s32.totalorder %v24_v29, %v31_v31  ;;  %vm49_vm10 = vcmp.eq.s32.totalorder %v25_v28, %v37_v37 }
  0x7e   :  { %v546_v34 = vsel %vm43_vm1, 1.0, %v710_v32  ;;  %vm633_vm5 = vmpackc.low %vm41_vm3, %vm38_vm2  ;;  %vm47_vm12 = vcmp.eq.s32.totalorder %v826_v26, %v37_v37  ;;  %v552_v39 = vsel %vm49_vm10, 1.0, %v710_v32  ;;  %vm48_vm14 = vcmp.eq.s32.totalorder %v24_v29, %v37_v37 }
  0x7f   :  { %634 = vmatmul.msk.bf16.vlgmr.msra.gmra.mxu0 %vm633_vm5, %v711_v35  ;;  %vm637_vm8 = vmpackc.low %vm42_vm4, %vm39_vm6  ;;  %v76_v36 = vpack.c.bf16 %v546_v34, %v543_v33  ;;  %v79_v40 = vpack.c.bf16 %v552_v39, %v549_v38  ;;  %vm332_vm1 = vcmask 261120   ;;  %vm362_vm2 = vcmp.lt.s32.totalorder %v826_v26, 8  ;;  %v409_v38 = vpop.permute.xlu2 %408 }
  0x80   :  { %638 = vmatmul.msk.bf16.vlgmr.msra.gmra.mxu1 %vm637_vm8, %v711_v35  ;;  %vm635_vm15 = vmpackc.low %vm47_vm12, %vm44_vm11  ;;  %vm445_vm3 = vcmp.ne.s32.totalorder %v750_v2, 0  ;;  %vm443_vm4 = vcmp.ne.s32.totalorder %v744_v1, 0  ;;  %vm446_vm5 = vcmp.ne.s32.totalorder %v777_v9, 0  ;;  %vm444_vm6 = vcmp.ne.s32.totalorder %v772_v8, 0 }
  0x81   :  { %641 = vmatmul.msk.bf16.vlgmr.msra.gmra.mxu2 %vm244_vm7, %v76_v36  ;;  %vm639_vm0 = vmpackc.low %vm48_vm14, %vm45_vm13  ;;  %v449_v34 = vsel %vm445_vm3, 1, %v709_v0  ;;  %v450_v36 = vsel %vm446_vm5, 1, %v709_v0  ;;  %v448_v37 = vsel %vm444_vm6, 1, %v709_v0  ;;  %vm439_vm11 = vcmp.eq.s32.totalorder %v744_v1, 1 }
  0x82   :  { %vm441_vm13 = vcmp.eq.s32.totalorder %v750_v2, 1  ;;  %vm471_vm3 = vcmask 23568  }
  0x87   :  { %v412_v39 = vpop.permute.xlu2 %411 }
  0x88   :  { %vm420_vm8 = vcmp.eq.s32.totalorder %v826_v26, %v412_v39 }
  0x8f   :  { %636 = vmatmul.msk.bf16.gmra.mxu0 %vm635_vm15, %v711_v35 }
  0x90   :  { %640 = vmatmul.msk.bf16.gmra.mxu1 %vm639_vm0, %v711_v35  ;;  %v447_v35 = vsel %vm443_vm4, 1, %v709_v0  ;;  %vm442_vm0 = vcmp.eq.s32.totalorder %v777_v9, 1  ;;  %vm440_vm4 = vcmp.eq.s32.totalorder %v772_v8, 1 }
  0x91   :  { %642 = vmatmul.msk.bf16.gmra.mxu2 %vm244_vm7, %v79_v40  ;;  %v415_v40 = vpop.permute.xlu2 %414  ;;  %vm419_vm7 = vcmp.eq.s32.totalorder %v826_v26, %v409_v38 }
  0x92   :  { %vm421_vm10 = vcmp.eq.s32.totalorder %v826_v26, %v415_v40 }
  0x99   :  { %v418_v41 = vpop.permute.xlu2 %417 }
  0x9a   :  { %vm422_vm9 = vcmp.eq.s32.totalorder %v826_v26, %v418_v41 }
  0xfc   :  { %v260_v43 = vpop.f32.mrf.mxu0 }
  0xfd   :  { %v279_v44 = vpop.f32.mrf.mxu1  ;;  %v261_v50 = vadd.f32 %v260_v43, %v120_v45 }
  0xff   :  { %v280_v53 = vadd.f32 %v279_v44, %v261_v50 }
 0x104   :  { %v262_v47 = vpop.f32.mrf.mxu0  ;;  %v298_v48 = vpop.f32.mrf.mxu2 }
 0x105   :  { %v281_v51 = vpop.f32.mrf.mxu1  ;;  %v263_v52 = vadd.f32 %v262_v47, %v121_v46  ;;  %v299_v55 = vadd.f32 %v298_v48, %v280_v53 }
 0x107   :  { %v282_v54 = vadd.f32 %v281_v51, %v263_v52  ;;  %v308_v59 = vmax.f32 %v299_v55, 0.0 }
 0x10c   :  { %v265_v56 = vpop.f32.mrf.mxu0  ;;  %v300_v57 = vpop.f32.mrf.mxu2 }
 0x10d   :  { %v301_v58 = vadd.f32 %v300_v57, %v282_v54  ;;  %v284_v61 = vpop.f32.mrf.mxu1  ;;  %v266_v6 = vadd.f32 %v265_v56, %v122_v63  ;;  %v714_v57 = vmov 2  }
 0x10e   :  { %688 = vset.pattern.permute.xlu1 %v714_v57  ;;  %689 = vset.pattern.permute.xlu0 %v714_v57 }
 0x10f   :  { %v309_v60 = vmax.f32 %v301_v58, 0.0  ;;  %v285_v10 = vadd.f32 %v284_v61, %v266_v6 }
 0x111   :  { %v312_v62 = vpack.c.bf16 %v309_v60, %v308_v59 }
 0x113   :  { %651 = vmatmul.msk.bf16.vlgmr.msra.gmra.mxu3 %vm332_vm1, %v312_v62 }
 0x114   :  { %v267_v4 = vpop.f32.mrf.mxu0  ;;  %v303_v5 = vpop.f32.mrf.mxu2 }
 0x115   :  { %v268_v7 = vadd.f32 %v267_v4, %v123_v3  ;;  %v286_v11 = vpop.f32.mrf.mxu1  ;;  %v304_v13 = vadd.f32 %v303_v5, %v285_v10 }
 0x117   :  { %v287_v12 = vadd.f32 %v286_v11, %v268_v7  ;;  %v310_v16 = vmax.f32 %v304_v13, 0.0 }
 0x11c   :  { %v305_v14 = vpop.f32.mrf.mxu2 }
 0x11d   :  { %v306_v15 = vadd.f32 %v305_v14, %v287_v12 }
 0x11f   :  { %v311_v17 = vmax.f32 %v306_v15, 0.0 }
 0x121   :  { %v313_v18 = vpack.c.bf16 %v311_v17, %v310_v16 }
 0x123   :  { %652 = vmatmul.msk.bf16.gmra.mxu3 %vm332_vm1, %v313_v18 }
 0x196   :  { %v348_v20 = vpop.f32.mrf.mxu3 }
 0x197   :  { %v349_v21 = vadd.f32 %v690_v19, %v348_v20 }
 0x199   :  { %358 = vst [vmem:[%s983_s4] sm:$0xff] %v349_v21  ;;  %v363_v22 = vsel %vm362_vm2, %v349_v21, -1e+30  ;;  %v423_v56 = vsel %vm419_vm7, %v349_v21, 0.0 }
 0x19a   :  { %367 = vmax.xlane.f32.xlu2 %v363_v22 }
 0x19e   :  { %v350_v23 = vpop.f32.mrf.mxu3 }
 0x19f   :  { %v873_v24 = vadd.f32 %v690_v19, %v350_v23 }
 0x1a1   :  { %359 = vst [vmem:[%s983_s4 + $0x8] sm:$0xff] %v873_v24  ;;  %v364_v25 = vsel %vm362_vm2, %v873_v24, -1e+30  ;;  %v424_v60 = vsel %vm420_vm8, %v873_v24, 0.0 }
 0x1a2   :  { %369 = vmax.xlane.f32.xlu2 %v364_v25 }
 0x1a6   :  { %v353_v27 = vpop.f32.mrf.mxu3 }
 0x1a7   :  { %v882_v28 = vadd.f32 %v690_v19, %v353_v27 }
 0x1a9   :  { %360 = vst [vmem:[%s983_s4 + $0x10] sm:$0xff] %v882_v28  ;;  %v365_v29 = vsel %vm362_vm2, %v882_v28, -1e+30  ;;  %v425_v3 = vsel %vm421_vm10, %v882_v28, 0.0 }
 0x1aa   :  { %371 = vmax.xlane.f32.xlu0 %v365_v29 }
 0x1ae   :  { %v355_v30 = vpop.f32.mrf.mxu3 }
 0x1af   :  { %v356_v31 = vadd.f32 %v690_v19, %v355_v30 }
 0x1b1   :  { %361 = vst [vmem:[%s983_s4 + $0x18] sm:$0xff] %v356_v31  ;;  %v366_v33 = vsel %vm362_vm2, %v356_v31, -1e+30  ;;  %v426_v61 = vsel %vm422_vm9, %v356_v31, 0.0 }
 0x1b2   :  { %373 = vmax.xlane.f32.xlu1 %v366_v33 }
 0x1ba   :  { %455 = vrot.lane.b32.xlu2 %v449_v34, %s713_s28 }
 0x1be   :  { %451 = vrot.lane.b32.xlu0 %v447_v35, %s713_s28 }
 0x1c2   :  { %457 = vrot.lane.b32.xlu2 %v450_v36, %s713_s28 }
 0x1cb   :  { %453 = vrot.lane.b32.xlu1 %v448_v37, %s713_s28 }
 0x20d   :  { %v904_v42 = vpop.xlane.xlu2 %367 }
 0x20e   :  { %v375_v43 = vsub.f32 %v363_v22, %v904_v42 }
 0x210   :  { %v379_v44 = vmul.f32 1.442695, %v375_v43 }
 0x212   :  { %691 = vpow2.f32 %v379_v44 }
 0x215   :  { %v907_v45 = vpop.xlane.xlu2 %369 }
 0x216   :  { %v376_v46 = vsub.f32 %v364_v25, %v907_v45 }
 0x218   :  { %v692_v47 = vpop.eup %691  ;;  %v381_v48 = vmul.f32 1.442695, %v376_v46 }
 0x219   :  { %387 = vadd.xlane.f32.xlu0 %v692_v47 }
 0x21a   :  { %693 = vpow2.f32 %v381_v48 }
 0x21d   :  { %v910_v0 = vpop.xlane.xlu0 %371  ;;  %v456_v58 = vpop.permute.xlu2 %455 }
 0x21e   :  { %v377_v49 = vsub.f32 %v365_v29, %v910_v0  ;;  %vm461_vm14 = vcmp.ne.s32.totalorder %v456_v58, 0 }
 0x21f   :  { %vm929_vm2 = vmand %vm441_vm13, %vm461_vm14  ;;  %vm522_vm13 = vcmp.eq.s32.totalorder %v826_v26, 0 }
 0x220   :  { %v694_v50 = vpop.eup %693  ;;  %v383_v51 = vmul.f32 1.442695, %v377_v49  ;;  %v655_v9 = vsel %vm929_vm2, 1.0, %v710_v32 }
 0x221   :  { %389 = vadd.xlane.f32.xlu2 %v694_v50  ;;  %v496_v12 = vsel %vm471_vm3, %v655_v9, 0.0 }
 0x222   :  { %695 = vpow2.f32 %v383_v51 }
 0x225   :  { %v914_v52 = vpop.xlane.xlu1 %373  ;;  %v458_v63 = vpop.permute.xlu2 %457 }
 0x226   :  { %v378_v53 = vsub.f32 %v366_v33, %v914_v52  ;;  %vm462_vm1 = vcmp.ne.s32.totalorder %v458_v63, 0 }
 0x227   :  { %vm937_vm5 = vmand %vm442_vm0, %vm462_vm1 }
 0x228   :  { %v696_v54 = vpop.eup %695  ;;  %v385_v55 = vmul.f32 1.442695, %v378_v53  ;;  %v656_v11 = vsel %vm937_vm5, 1.0, %v710_v32 }
 0x229   :  { %391 = vadd.xlane.f32.xlu1 %v696_v54  ;;  %427 = vadd.xlane.f32.xlu2 %v423_v56  ;;  %v498_v15 = vsel %vm471_vm3, %v656_v11, 0.0 }
 0x22a   :  { %697 = vpow2.f32 %v385_v55 }
 0x230   :  { %v698_v59 = vpop.eup %697  ;;  %v452_v62 = vpop.permute.xlu0 %451 }
 0x231   :  { %429 = vadd.xlane.f32.xlu1 %v424_v60  ;;  %433 = vadd.xlane.f32.xlu2 %v426_v61  ;;  %vm459_vm12 = vcmp.ne.s32.totalorder %v452_v62, 0 }
 0x232   :  { %393 = vadd.xlane.f32.xlu0 %v698_v59  ;;  %vm924_vm15 = vmand %vm439_vm11, %vm459_vm12  ;;  %vm523_vm12 = vcmp.eq.s32.totalorder %v826_v26, 1 }
 0x233   :  { %v653_v1 = vsel %vm924_vm15, 1.0, %v710_v32 }
 0x234   :  { %v493_v8 = vsel %vm471_vm3, %v653_v1, 0.0 }
 0x23a   :  { %431 = vadd.xlane.f32.xlu0 %v425_v3 }
 0x23d   :  { %v454_v2 = vpop.permute.xlu1 %453 }
 0x23e   :  { %vm460_vm6 = vcmp.ne.s32.totalorder %v454_v2, 0 }
 0x23f   :  { %vm944_vm7 = vmand %vm440_vm4, %vm460_vm6 }
 0x240   :  { %v654_v10 = vsel %vm944_vm7, 1.0, %v710_v32 }
 0x241   :  { %v494_v13 = vsel %vm471_vm3, %v654_v10, 0.0 }
 0x242   :  { %v495_v14 = vadd.f32 %v494_v13, %v493_v8 }
 0x244   :  { %v497_v16 = vadd.f32 %v496_v12, %v495_v14 }
 0x246   :  { %v499_v17 = vadd.f32 %v498_v15, %v497_v16 }
 0x248   :  { %v500_v18 = vrot.slane %v499_v17, 4 }
 0x24a   :  { %v501_v19 = vadd.f32 %v500_v18, %v499_v17 }
 0x24c   :  { %v502_v20 = vrot.slane %v501_v19, 2 }
 0x24e   :  { %v503_v21 = vadd.f32 %v502_v20, %v501_v19 }
 0x250   :  { %v504_v22 = vrot.slane %v503_v21, 1 }
 0x252   :  { %v505_v23 = vadd.f32 %v504_v22, %v503_v21 }
 0x254   :  { %526 = vperm.xlu1 %688, %v505_v23   ;;  %v506_v30 = vmax.f32 %v505_v23, 1.0 }
 0x256   :  { %vm512_vm8 = vweird.f32 %v506_v30  ;;  %v518_v1 = vand.u32 2147483648, %v506_v30  ;;  %v516_v9 = vand.u32 2147483647, %v506_v30 }
 0x258   :  { %v519_v8 = vor.u32 1.1754944e-38, %v518_v1  ;;  %vm517_vm11 = vcmp.eq.f32.partialorder %v516_v9, 8.507059e+37 }
 0x28c   :  { %v388_v25 = vpop.xlane.xlu0 %387 }
 0x294   :  { %v390_v24 = vpop.xlane.xlu2 %389 }
 0x295   :  { %699 = vlog2.f32 %v390_v24 }
 0x296   :  { %701 = vlog2.f32 %v388_v25 }
 0x29b   :  { %v700_v27 = vpop.eup %699 }
 0x29c   :  { %v392_v32 = vpop.xlane.xlu1 %391  ;;  %v702_v28 = vpop.eup %701  ;;  %v398_v29 = vmul.f32 0.6931472, %v700_v27 }
 0x29d   :  { %703 = vlog2.f32 %v392_v32  ;;  %v396_v31 = vmul.f32 0.6931472, %v702_v28  ;;  %v428_v36 = vpop.xlane.xlu2 %427 }
 0x29e   :  { %v404_v34 = vadd.f32 %v398_v29, %v907_v45  ;;  %705 = vrcp.f32 %v506_v30 }
 0x29f   :  { %v403_v38 = vadd.f32 %v396_v31, %v904_v42 }
 0x2a1   :  { %v435_v41 = vsub.f32 %v403_v38, %v428_v36 }
 0x2a3   :  { %v704_v35 = vpop.eup %703  ;;  %v467_v47 = vsel %vm924_vm15, %v435_v41, 0.0 }
 0x2a4   :  { %v430_v33 = vpop.xlane.xlu1 %429  ;;  %v400_v40 = vmul.f32 0.6931472, %v704_v35  ;;  %v706_v44 = vpop.eup %705  ;;  %v472_v42 = vsel %vm471_vm3, %v467_v47, 0.0 }
 0x2a5   :  { %v394_v37 = vpop.xlane.xlu0 %393  ;;  %v436_v39 = vsub.f32 %v404_v34, %v430_v33  ;;  %v508_v54 = vmul.f32 %v706_v44, %v506_v30  ;;  %v434_v56 = vpop.xlane.xlu2 %433  ;;  %vm513_vm9 = vweird.f32 %v706_v44 }
 0x2a6   :  { %707 = vlog2.f32 %v394_v37  ;;  %v405_v45 = vadd.f32 %v400_v40, %v910_v0  ;;  %vm514_vm10 = vmor %vm512_vm8, %vm513_vm9 }
 0x2a7   :  { %v468_v43 = vsel %vm944_vm7, %v436_v39, 0.0  ;;  %v509_v61 = vsub.f32 1.0, %v508_v54 }
 0x2a8   :  { %v473_v48 = vsel %vm471_vm3, %v468_v43, 0.0 }
 0x2a9   :  { %v474_v55 = vadd.f32 %v473_v48, %v472_v42  ;;  %v510_v4 = vmul.f32 %v706_v44, %v509_v61 }
 0x2ab   :  { %v511_v5 = vadd.f32 %v706_v44, %v510_v4 }
 0x2ac   :  { %v708_v46 = vpop.eup %707 }
 0x2ad   :  { %v402_v49 = vmul.f32 0.6931472, %v708_v46  ;;  %v432_v50 = vpop.xlane.xlu0 %431  ;;  %v515_v11 = vsel %vm514_vm10, %v706_v44, %v511_v5 }
 0x2ae   :  { %v437_v51 = vsub.f32 %v405_v45, %v432_v50  ;;  %v520_v12 = vsel %vm517_vm11, %v519_v8, %v515_v11 }
 0x2af   :  { %v406_v53 = vadd.f32 %v402_v49, %v914_v52 }
 0x2b0   :  { %v469_v57 = vsel %vm929_vm2, %v437_v51, 0.0 }
 0x2b1   :  { %v438_v58 = vsub.f32 %v406_v53, %v434_v56  ;;  %v475_v59 = vsel %vm471_vm3, %v469_v57, 0.0 }
 0x2b2   :  { %v476_v60 = vadd.f32 %v475_v59, %v474_v55 }
 0x2b3   :  { %v470_v0 = vsel %vm937_vm5, %v438_v58, 0.0 }
 0x2b4   :  { %v477_v62 = vsel %vm471_vm3, %v470_v0, 0.0 }
 0x2b5   :  { %v478_v63 = vadd.f32 %v477_v62, %v476_v60 }
 0x2b7   :  { %v479_v3 = vrot.slane %v478_v63, 4 }
 0x2b9   :  { %v480_v52 = vadd.f32 %v479_v3, %v478_v63 }
 0x2bb   :  { %v481_v2 = vrot.slane %v480_v52, 2 }
 0x2bd   :  { %v482_v7 = vadd.f32 %v481_v2, %v480_v52 }
 0x2bf   :  { %v483_v10 = vrot.slane %v482_v7, 1 }
 0x2c1   :  { %v484_v6 = vadd.f32 %v483_v10, %v482_v7 }
 0x2c3   :  { %v521_v13 = vmul.f32 %v520_v12, %v484_v6 }
 0x2c5   :  { %532 = vperm.xlu0 %689, %v521_v13  }
 0x2c6   :  { %v527_v14 = vpop.permute.xlu1 %526 }
 0x2c7   :  { %v529_v15 = vsel %vm523_vm12, %v527_v14, 0.0 }
 0x337   :  { %v533_v16 = vpop.permute.xlu0 %532 }
 0x338   :  { %v535_v17 = vsel %vm522_vm13, %v533_v16, %v529_v15 }
 0x339   :  { %536 = vst [vmem:[%s983_s4 + $0x20] sm:$0xff] %v535_v17 }

</bundles_post_ra>
